<compile_context>
chip_gen: v6e
topology: v6e:2x2x1
jax: 0.10.0
libtpu: 0.0.40
codegen_flags: <defaults>
</compile_context>

<pallas_src>
import functools
import math

import numpy as np

import jax
import jax.numpy as jnp
from jax.experimental import pallas as pl
from jax.experimental.pallas import tpu as pltpu

SCALE_WEIGHT = 0.5 ** 0.5


def _round_up(x, m):
    return (x + m - 1) // m * m


# ----------------------------------------------------------------------------- kernel


def _stacked_glu_kernel(x_ref, w_ref, b_ref, o_ref, *, num_layers, hc, matmul_dtype):
    """x_ref/o_ref: (TILE_M, HC).  w_ref: (L, HC, 2*HC) in matmul_dtype.  b_ref: (L, 1, 2*HC) f32."""
    x = x_ref[...].astype(jnp.float32)                     # residual path in f32
    # num_layers is a small compile-time constant -> unrolled on purpose.
    for l in range(num_layers):
        xm = x.astype(matmul_dtype)
        # One fused matmul per layer: N = 2*HC (out columns first, gate columns second).
        y = jnp.dot(xm, w_ref[l], preferred_element_type=jnp.float32) + b_ref[l]
        out = y[:, :hc]                                    # lane-aligned split (hc % 128 == 0)
        gate = y[:, hc:]
        # GLU + residual + scale:  x = (x + out * sigmoid(gate)) * sqrt(0.5)
        x = (x + out * jax.nn.sigmoid(gate)) * SCALE_WEIGHT
    o_ref[...] = x.astype(o_ref.dtype)


# ------------------------------------------------------------------- host-side helpers


def build_banded_params(weights, biases, H, hc_pad, matmul_dtype):
    """Fold the (width,1) conv (with 'same' zero padding) + GLU split into ONE block-banded
    matrix per layer operating on the flattened (h, c) feature axis, with the out half in
    columns [0, HC) and the gate half in columns [hc_pad, hc_pad+HC).

    weights: (L, width, C, 2C) per-tap form (w[l, k, c, d] == torch weight[d, c, k, 0]).
    biases:  (L, 2C)
    Returns  w: (L, hc_pad, 2*hc_pad) in matmul_dtype,  b: (L, 1, 2*hc_pad) f32.
    """
    weights = np.asarray(weights, dtype=np.float32)
    biases = np.asarray(biases, dtype=np.float32)
    L, width, C, twoC = weights.shape
    assert twoC == 2 * C
    pad = width // 2
    HC = H * C
    assert hc_pad >= HC

    w = np.zeros((L, hc_pad, 2 * hc_pad), dtype=np.float32)
    for h_out in range(H):
        o0 = h_out * C
        for k in range(width):
            h_in = h_out + k - pad
            if 0 <= h_in < H:            # taps outside [0, H) == zero padding
                i0 = h_in * C
                w[:, i0:i0 + C, o0:o0 + C] = weights[:, k, :, :C]                       # out
                w[:, i0:i0 + C, hc_pad + o0:hc_pad + o0 + C] = weights[:, k, :, C:]     # gate

    b = np.zeros((L, 1, 2 * hc_pad), dtype=np.float32)
    b[:, 0, :HC] = np.tile(biases[:, None, :C], (1, H, 1)).reshape(L, HC)
    b[:, 0, hc_pad:hc_pad + HC] = np.tile(biases[:, None, C:], (1, H, 1)).reshape(L, HC)
    # Pre-cast weights to the matmul dtype (bf16 by default); biases stay f32 (added post-MXU).
    return jnp.asarray(w).astype(matmul_dtype), jnp.asarray(b)


def _vmem_capacity_bytes():
    try:
        return int(pltpu.get_tpu_info().vmem_capacity_bytes)
    except Exception:
        return 64 << 20          # conservative fallback: smallest per-core VMEM (v7x)


def _choose_tiling(M, hc_pad, L, tile_m, matmul_itemsize):
    """Pick tile_m and a vmem_limit per TPU generation.

    Rather than clamping the VMEM limit below the real requirement, shrink tile_m until the
    estimate fits the per-generation budget.
    """
    cap = _vmem_capacity_bytes()
    budget = min(cap - (8 << 20), int(cap * 0.80))       # ~100 MiB on 128 MiB chips, ~51 MiB on v7x

    # Fixed resident cost: fused weights + biases (pipeline still allocates 2 buffers even
    # though the constant index_map means they are only DMA'd once).
    w_bytes = L * hc_pad * (2 * hc_pad) * matmul_itemsize
    b_bytes = L * 8 * (2 * hc_pad) * 4                   # (L,1,2HC) sublane-pads 1 -> 8
    fixed = 2 * (w_bytes + b_bytes)
    headroom = 4 << 20

    def tile_cost(tm):
        io = 4 * tm * hc_pad * 4                         # x in + out, double-buffered, f32
        tmp = tm * (2 * hc_pad) * 4 + tm * hc_pad * (4 + matmul_itemsize)   # y, x, xm temporaries
        return io + tmp

    if tile_m is None:
        # Big tiles amortize the ~0.35 us per-grid-step overhead on 128 MiB chips; smaller
        # target on v7x.  Cap so the M grid has >= 4 steps (pipeline depth + megacore work).
        target = 1024 if budget >= (72 << 20) else 512
        tile_m = min(target, max(8, _round_up(pl.cdiv(M, 4), 8)))
    tile_m = max(8, _round_up(int(tile_m), 8))

    while tile_m > 8 and fixed + headroom + tile_cost(tile_m) > budget:
        tile_m = max(8, _round_up(tile_m // 2, 8))

    vmem_limit = int(max(16 << 20, fixed + headroom + tile_cost(tile_m)))
    return tile_m, vmem_limit


def stacked_cnn_pallas(x_nchw, weights, biases, width, *, tile_m=None,
                       matmul_dtype=jnp.bfloat16):
    """x_nchw: (N, C, H, W); weights: (L, width, C, 2C); biases: (L, 2C).

    matmul_dtype=jnp.bfloat16 (default) runs the MXU at full rate; pass jnp.float32 for
    bit-accurate-vs-f32-reference behaviour.
    """
    N, C, H, W = x_nchw.shape
    L = int(weights.shape[0])
    # Even widths would not reproduce nn.Conv2d(padding=width//2) output length.
    assert width % 2 == 1, "only odd kernel widths are supported (match PyTorch 'same' pad)"

    M = N * W
    HC = H * C
    HC_pad = _round_up(HC, 128)                          # lane-dense feature axis
    matmul_itemsize = jnp.dtype(matmul_dtype).itemsize

    tile_m, vmem_limit = _choose_tiling(M, HC_pad, L, tile_m, matmul_itemsize)
    M_pad = _round_up(M, tile_m)

    # NCHW -> (M, H*C): row m = (n, w) column; lane index = h*C + c (dense).  The ragged-M
    # and lane pads are a single op fused with this transpose.
    # TODO(synk): accept an NWHC layout (or swizzle in-kernel) to drop this HBM round trip.
    x_flat = jnp.transpose(x_nchw, (0, 3, 2, 1)).reshape(M, HC)
    if M_pad != M or HC_pad != HC:
        x_flat = jnp.pad(x_flat, ((0, M_pad - M), (0, HC_pad - HC)))

    w_fused, b_fused = build_banded_params(weights, biases, H, HC_pad, matmul_dtype)

    grid = (M_pad // tile_m,)

    kernel = functools.partial(_stacked_glu_kernel, num_layers=L, hc=HC_pad,
                               matmul_dtype=matmul_dtype)

    cost = pl.CostEstimate(
        flops=int(2 * M_pad * HC_pad * 2 * HC_pad * L),
        transcendentals=int(M_pad * HC_pad * L),
        bytes_accessed=int(2 * M_pad * HC_pad * 4
                           + L * HC_pad * 2 * HC_pad * matmul_itemsize
                           + L * 2 * HC_pad * 4),
    )

    out_flat = pl.pallas_call(
        kernel,
        out_shape=jax.ShapeDtypeStruct((M_pad, HC_pad), x_flat.dtype),
        grid=grid,
        in_specs=[
            pl.BlockSpec((tile_m, HC_pad), lambda i: (i, 0)),            # x tile (pipelined)
            pl.BlockSpec((L, HC_pad, 2 * HC_pad), lambda i: (0, 0, 0)),  # fused weights (resident)
            pl.BlockSpec((L, 1, 2 * HC_pad), lambda i: (0, 0, 0)),       # fused biases (resident)
        ],
        out_specs=pl.BlockSpec((tile_m, HC_pad), lambda i: (i, 0)),
        compiler_params=pltpu.CompilerParams(
            dimension_semantics=("parallel",),
            vmem_limit_bytes=vmem_limit,
        ),
        cost_estimate=cost,
    )(x_flat, w_fused, b_fused)

    # (M, H*C) -> NCHW (drop M / lane padding)
    out_flat = out_flat[:M, :HC]
    return jnp.transpose(out_flat.reshape(N, W, H, C), (0, 3, 2, 1))


# --------------------------------------------------------------------------- reference


def stacked_cnn_reference(x_nchw, weights, biases, width):
    """Pure-JAX reference with per-tap conv math (independent of the banded folding)."""
    N, C, H, W = x_nchw.shape
    L = weights.shape[0]
    pad = width // 2
    M = N * W
    x = jnp.transpose(x_nchw, (0, 3, 2, 1)).reshape(M, H, C).astype(jnp.float32)
    for l in range(L):
        xp = jnp.pad(x, ((0, 0), (pad, pad), (0, 0)))
        acc = jnp.broadcast_to(biases[l][None, None, :], (M, H, 2 * C)).astype(jnp.float32)
        for k in range(width):
            acc = acc + jnp.einsum("mhc,cd->mhd", xp[:, k:k + H, :], weights[l, k],
                                   precision=jax.lax.Precision.HIGHEST)
        out, gate = acc[..., :C], acc[..., C:]
        x = (x + out * jax.nn.sigmoid(gate)) * SCALE_WEIGHT
    return jnp.transpose(x.reshape(N, W, H, C), (0, 3, 2, 1)).astype(x_nchw.dtype)


def make_params(key, num_layers, input_size, width, dropout=0.2):
    """Deterministic init mirroring GatedConv.__init__ shapes/scales.

    PyTorch conv weight is (2C, C, width, 1); we store the per-tap transposed form
    (L, width, C, 2C) so out = first C output columns, gate = second C (same order as
    torch.split / F.glu on the channel axis).
    """
    C = input_size
    gain = (4.0 * (1.0 - dropout)) ** 0.5
    fan_in = C * width
    fan_out = 2 * C * width
    w_bound = gain * math.sqrt(6.0 / (fan_in + fan_out))   # xavier_uniform_
    b_bound = 1.0 / math.sqrt(fan_in)                      # Conv2d default bias init
    kw, kb = jax.random.split(key)
    weights = jax.random.uniform(
        kw, (num_layers, width, C, 2 * C), jnp.float32, -w_bound, w_bound)
    biases = jax.random.uniform(
        kb, (num_layers, 2 * C), jnp.float32, -b_bound, b_bound)
    return weights, biases


if __name__ == "__main__":
    key = jax.random.PRNGKey(0)
    k_x, k_p, k_x2 = jax.random.split(key, 3)

    num_layers = 3
    cnn_kernel_width = 3
    C = 4

    weights, biases = make_params(k_p, num_layers, C, cnn_kernel_width)

    # Case 1: H*C = 128 -> exactly lane-dense flat layout.
    N, H, W = 2, 32, 16
    x = jax.random.normal(k_x, (N, C, H, W), dtype=jnp.float32)
    ref = jax.block_until_ready(stacked_cnn_reference(x, weights, biases, cnn_kernel_width))

    # 1a) f32 matmul path: bit-level check of the fused banded-matmul formulation.
    out_f32 = jax.block_until_ready(
        stacked_cnn_pallas(x, weights, biases, cnn_kernel_width, matmul_dtype=jnp.float32))
    assert out_f32.shape == (N, C, H, W)
    assert jnp.allclose(out_f32, ref, atol=2e-4, rtol=2e-3), (
        f"f32 mismatch vs JAX reference (max abs err {jnp.max(jnp.abs(out_f32 - ref))})")

    # 1b) default bf16 matmul path: check relative-to-scale error.
    out_bf16 = jax.block_until_ready(
        stacked_cnn_pallas(x, weights, biases, cnn_kernel_width))
    rel_err = jnp.max(jnp.abs(out_bf16 - ref)) / (jnp.max(jnp.abs(ref)) + 1e-6)
    assert rel_err < 5e-2, f"bf16 mismatch vs JAX reference (rel-to-scale err {rel_err})"

    # Case 2: M not a multiple of the tile and H*C not a multiple of 128 (lane padding path).
    N2, H2, W2 = 3, 16, 10
    x2 = jax.random.normal(k_x2, (N2, C, H2, W2), dtype=jnp.float32)
    ref2 = jax.block_until_ready(stacked_cnn_reference(x2, weights, biases, cnn_kernel_width))

    out2_f32 = jax.block_until_ready(
        stacked_cnn_pallas(x2, weights, biases, cnn_kernel_width, matmul_dtype=jnp.float32))
    assert out2_f32.shape == (N2, C, H2, W2)
    assert jnp.allclose(out2_f32, ref2, atol=2e-4, rtol=2e-3), (
        f"f32 mismatch vs JAX reference (max abs err {jnp.max(jnp.abs(out2_f32 - ref2))})")

    out2_bf16 = jax.block_until_ready(
        stacked_cnn_pallas(x2, weights, biases, cnn_kernel_width))
    rel_err2 = jnp.max(jnp.abs(out2_bf16 - ref2)) / (jnp.max(jnp.abs(ref2)) + 1e-6)
    assert rel_err2 < 5e-2, f"bf16 mismatch vs JAX reference (rel-to-scale err {rel_err2})"

    print("KERNEL_OK")
</pallas_src>

<mosaic_0001>
module attributes {stable_mosaic.version = 11 : i64} {
  func.func @_stacked_glu_kernel(%arg0: i32, %arg1: memref<8x128xf32, #tpu.memory_space<vmem>>, %arg2: memref<3x128x256xf32, #tpu.memory_space<vmem>>, %arg3: memref<3x1x256xf32, #tpu.memory_space<vmem>>, %arg4: memref<8x128xf32, #tpu.memory_space<vmem>>) attributes {dimension_semantics = [#tpu.dimension_semantics<parallel>], iteration_bounds = array<i64: 4>, scalar_prefetch = 0 : i64, scratch_operands = 0 : i64, tpu.core_type = #tpu.core_type<tc>, window_params = [{transform_indices = @transform_0, window_bounds = array<i64: 8, 128>}, {pipeline_mode = #tpu.pipeline_mode<synchronous>, transform_indices = @transform_1, window_bounds = array<i64: 3, 128, 256>}, {pipeline_mode = #tpu.pipeline_mode<synchronous>, transform_indices = @transform_2, window_bounds = array<i64: 3, 1, 256>}, {transform_indices = @transform_3, window_bounds = array<i64: 8, 128>}]} {
    %c0 = arith.constant 0 : index
    %c0_0 = arith.constant 0 : index
    %0 = vector.load %arg1[%c0, %c0_0] : memref<8x128xf32, #tpu.memory_space<vmem>>, vector<8x128xf32>
    %c0_1 = arith.constant 0 : index
    %c0_2 = arith.constant 0 : index
    %c0_3 = arith.constant 0 : index
    %1 = vector.load %arg2[%c0_1, %c0_2, %c0_3] : memref<3x128x256xf32, #tpu.memory_space<vmem>>, vector<1x128x256xf32>
    %2 = vector.shape_cast %1 : vector<1x128x256xf32> to vector<128x256xf32>
    %cst = arith.constant dense<0.000000e+00> : vector<8x256xf32>
    %3 = tpu.matmul %0, %2, %cst {dimension_numbers = #tpu.dot_dimension_numbers<[1], [0], [0], [1], [0, 0, 1, 1], [], []>} : vector<8x128xf32>, vector<128x256xf32>, vector<8x256xf32> -> vector<8x256xf32>
    %c0_4 = arith.constant 0 : index
    %c0_5 = arith.constant 0 : index
    %c0_6 = arith.constant 0 : index
    %4 = vector.load %arg3[%c0_4, %c0_5, %c0_6] : memref<3x1x256xf32, #tpu.memory_space<vmem>>, vector<1x1x256xf32>
    %5 = vector.shape_cast %4 : vector<1x1x256xf32> to vector<1x256xf32>
    %6 = vector.broadcast %5 : vector<1x256xf32> to vector<8x256xf32>
    %7 = arith.addf %3, %6 : vector<8x256xf32>
    %8 = vector.extract_strided_slice %7 {offsets = [0, 0], sizes = [8, 128], strides = [1, 1]} : vector<8x256xf32> to vector<8x128xf32>
    %9 = vector.extract_strided_slice %7 {offsets = [0, 128], sizes = [8, 128], strides = [1, 1]} : vector<8x256xf32> to vector<8x128xf32>
    %10 = arith.negf %9 : vector<8x128xf32>
    %11 = math.exp %10 : vector<8x128xf32>
    %cst_7 = arith.constant 1.000000e+00 : f32
    %12 = vector.broadcast %cst_7 : f32 to vector<8x128xf32>
    %13 = arith.addf %12, %11 : vector<8x128xf32>
    %14 = arith.divf %12, %13 : vector<8x128xf32>
    %15 = arith.mulf %8, %14 : vector<8x128xf32>
    %16 = arith.addf %0, %15 : vector<8x128xf32>
    %cst_8 = arith.constant 0.707106769 : f32
    %17 = vector.broadcast %cst_8 : f32 to vector<8x128xf32>
    %18 = arith.mulf %16, %17 : vector<8x128xf32>
    %c1 = arith.constant 1 : index
    %c0_9 = arith.constant 0 : index
    %c0_10 = arith.constant 0 : index
    %19 = vector.load %arg2[%c1, %c0_9, %c0_10] : memref<3x128x256xf32, #tpu.memory_space<vmem>>, vector<1x128x256xf32>
    %20 = vector.shape_cast %19 : vector<1x128x256xf32> to vector<128x256xf32>
    %cst_11 = arith.constant dense<0.000000e+00> : vector<8x256xf32>
    %21 = tpu.matmul %18, %20, %cst_11 {dimension_numbers = #tpu.dot_dimension_numbers<[1], [0], [0], [1], [0, 0, 1, 1], [], []>} : vector<8x128xf32>, vector<128x256xf32>, vector<8x256xf32> -> vector<8x256xf32>
    %c1_12 = arith.constant 1 : index
    %c0_13 = arith.constant 0 : index
    %c0_14 = arith.constant 0 : index
    %22 = vector.load %arg3[%c1_12, %c0_13, %c0_14] : memref<3x1x256xf32, #tpu.memory_space<vmem>>, vector<1x1x256xf32>
    %23 = vector.shape_cast %22 : vector<1x1x256xf32> to vector<1x256xf32>
    %24 = vector.broadcast %23 : vector<1x256xf32> to vector<8x256xf32>
    %25 = arith.addf %21, %24 : vector<8x256xf32>
    %26 = vector.extract_strided_slice %25 {offsets = [0, 0], sizes = [8, 128], strides = [1, 1]} : vector<8x256xf32> to vector<8x128xf32>
    %27 = vector.extract_strided_slice %25 {offsets = [0, 128], sizes = [8, 128], strides = [1, 1]} : vector<8x256xf32> to vector<8x128xf32>
    %28 = arith.negf %27 : vector<8x128xf32>
    %29 = math.exp %28 : vector<8x128xf32>
    %cst_15 = arith.constant 1.000000e+00 : f32
    %30 = vector.broadcast %cst_15 : f32 to vector<8x128xf32>
    %31 = arith.addf %30, %29 : vector<8x128xf32>
    %32 = arith.divf %30, %31 : vector<8x128xf32>
    %33 = arith.mulf %26, %32 : vector<8x128xf32>
    %34 = arith.addf %18, %33 : vector<8x128xf32>
    %cst_16 = arith.constant 0.707106769 : f32
    %35 = vector.broadcast %cst_16 : f32 to vector<8x128xf32>
    %36 = arith.mulf %34, %35 : vector<8x128xf32>
    %c2 = arith.constant 2 : index
    %c0_17 = arith.constant 0 : index
    %c0_18 = arith.constant 0 : index
    %37 = vector.load %arg2[%c2, %c0_17, %c0_18] : memref<3x128x256xf32, #tpu.memory_space<vmem>>, vector<1x128x256xf32>
    %38 = vector.shape_cast %37 : vector<1x128x256xf32> to vector<128x256xf32>
    %cst_19 = arith.constant dense<0.000000e+00> : vector<8x256xf32>
    %39 = tpu.matmul %36, %38, %cst_19 {dimension_numbers = #tpu.dot_dimension_numbers<[1], [0], [0], [1], [0, 0, 1, 1], [], []>} : vector<8x128xf32>, vector<128x256xf32>, vector<8x256xf32> -> vector<8x256xf32>
    %c2_20 = arith.constant 2 : index
    %c0_21 = arith.constant 0 : index
    %c0_22 = arith.constant 0 : index
    %40 = vector.load %arg3[%c2_20, %c0_21, %c0_22] : memref<3x1x256xf32, #tpu.memory_space<vmem>>, vector<1x1x256xf32>
    %41 = vector.shape_cast %40 : vector<1x1x256xf32> to vector<1x256xf32>
    %42 = vector.broadcast %41 : vector<1x256xf32> to vector<8x256xf32>
    %43 = arith.addf %39, %42 : vector<8x256xf32>
    %44 = vector.extract_strided_slice %43 {offsets = [0, 0], sizes = [8, 128], strides = [1, 1]} : vector<8x256xf32> to vector<8x128xf32>
    %45 = vector.extract_strided_slice %43 {offsets = [0, 128], sizes = [8, 128], strides = [1, 1]} : vector<8x256xf32> to vector<8x128xf32>
    %46 = arith.negf %45 : vector<8x128xf32>
    %47 = math.exp %46 : vector<8x128xf32>
    %cst_23 = arith.constant 1.000000e+00 : f32
    %48 = vector.broadcast %cst_23 : f32 to vector<8x128xf32>
    %49 = arith.addf %48, %47 : vector<8x128xf32>
    %50 = arith.divf %48, %49 : vector<8x128xf32>
    %51 = arith.mulf %44, %50 : vector<8x128xf32>
    %52 = arith.addf %36, %51 : vector<8x128xf32>
    %cst_24 = arith.constant 0.707106769 : f32
    %53 = vector.broadcast %cst_24 : f32 to vector<8x128xf32>
    %54 = arith.mulf %52, %53 : vector<8x128xf32>
    %c0_25 = arith.constant 0 : index
    %c0_26 = arith.constant 0 : index
    %55 = vector.load %arg4[%c0_25, %c0_26] : memref<8x128xf32, #tpu.memory_space<vmem>>, vector<8x128xf32>
    tpu.vector_store %arg4[%c0_25, %c0_26], %54 {strides = array<i32>} : memref<8x128xf32, #tpu.memory_space<vmem>>, vector<8x128xf32>,
    return
  }
  func.func @transform_0(%arg0: i32) -> (i32, i32) {
    %c0_i32 = arith.constant 0 : i32
    %c0_i32_0 = arith.constant 0 : i32
    return %arg0, %c0_i32 : i32, i32
  }
  func.func @transform_1(%arg0: i32) -> (i32, i32, i32) {
    %c0_i32 = arith.constant 0 : i32
    %c0_i32_0 = arith.constant 0 : i32
    %c0_i32_1 = arith.constant 0 : i32
    %c0_i32_2 = arith.constant 0 : i32
    return %c0_i32, %c0_i32_0, %c0_i32_1 : i32, i32, i32
  }
  func.func @transform_2(%arg0: i32) -> (i32, i32, i32) {
    %c0_i32 = arith.constant 0 : i32
    %c0_i32_0 = arith.constant 0 : i32
    %c0_i32_1 = arith.constant 0 : i32
    %c0_i32_2 = arith.constant 0 : i32
    return %c0_i32, %c0_i32_0, %c0_i32_1 : i32, i32, i32
  }
  func.func @transform_3(%arg0: i32) -> (i32, i32) {
    %c0_i32 = arith.constant 0 : i32
    %c0_i32_0 = arith.constant 0 : i32
    return %arg0, %c0_i32 : i32, i32
  }
}

</mosaic_0001>

<bundles_post_ra>
// kernel: tpu_custom_call.1
= control target key start
LH: loop header
LB: loop body
LE: loop exit
PB: predicated region body
PF: predicated region fallthrough
CT: control target
= control target key end

     0   :  { %8 = vsyncpa [#allocation3], 0  ;;  %s1169_s0 = inlined_call_operand.hbm [shape: f32[32,128], index: 0, kind: input, shape index: {}]   ;;  %s1170_s1 = inlined_call_operand.hbm [shape: f32[3,128,256], index: 1, kind: input, shape index: {}]   ;;  %s1171_s2 = inlined_call_operand.hbm [shape: f32[3,1,256], index: 2, kind: input, shape index: {}]   ;;  %s1172_s3 = inlined_call_operand.hbm [shape: f32[32,128], index: 3, kind: output, shape index: {}]  }
   0x1   :  { %10 = vsyncpa [#allocation3 + $0x1], 0 }
   0x2   :  { %11 = vsyncpa [#allocation6], 0 }
   0x3   :  { %12 = vsyncpa [#allocation4], 0 }
   0x4   :  { %14 = vsyncpa [#allocation4 + $0x1], 0  ;;  %s978_s12 = smov 0   ;;  %s980_s13 = smov 0  }
   0x5   :  { %s982_s14 = smov 0   ;;  %s984_s15 = smov 0  }
   0x6 LB: > { %s999_s16 = sadd.s32 4294967295, %s947_s15   ;;  %s696_s17 = sadd.s32 4294967294, %s947_s15   ;;  %s947_s15 = sphi %s984_s15, %s1193_s15   ;;  %s943_s14 = sphi %s982_s14, %s1192_s14   ;;  %s939_s13 = sphi %s980_s13, %s1191_s13   ;;  %s935_s12 = sphi %s978_s12, %s1190_s12  }
   0x7   : > { %p40_p0 = scmp.ne.s32.totalorder %s939_s13, %s935_s12  ;;  %p1173_p1 = scmp.eq.s32.totalorder %s999_s16, 0 }
   0x8   : > { %p112_p3 = scmp.eq.s32.totalorder %s696_s17, 3  ;;  %p697_p5 = scmp.ge.s32.totalorder %s947_s15, 1 }
   0x9   : > { %p1008_p4 = por %p1173_p1, %p40_p0  ;;  %p119_p7 = scmp.lt.s32.totalorder %s947_s15, 5 }
   0xa   : > { %p1013_p6 = por %p112_p3, %p40_p0  ;;  %s949_s21 = smov [#allocation5]  }
   0xb   : > { %s1177_s18 = scalar_select %p1008_p4, 1, 0 }
   0xc   : > { %s1178_s19 = scalar_select %p1013_p6, 1, 0 }
   0xd   : > { %p1018_p8 = pnand %p697_p5, %p119_p7  ;;  %s131_s22 = sshll.u32 %s949_s21, 4  ;;  %s132_s22 = int_to_ptr.vmem [resolvable:$true] %s131_s22 }
   0xe   : > { %s950_s24 = smov [#allocation7]   ;;  %s810_s26 = scalar_lea.vmem %s132_s22, 12288 }
   0xf   : > { %s1179_s20 = scalar_select %p1018_p8, 1, 0 }
  0x10   : > { %p727_p9 = pneg %p1018_p8  ;;  %s144_s25 = sshll.u32 %s950_s24, 4  ;;  %s145_s25 = int_to_ptr.vmem [resolvable:$true] %s144_s25 }
  0x11   : > { %p811_p12 = scmp.ne.s32.totalorder %s132_s22, %s810_s26  ;;  %p818_p3 = scmp.lt.s32.totalorder %s132_s22, %s132_s22 }
  0x12   : > { %p1026_p10 = pnand %p727_p9, %p1173_p1  ;;  %p819_p5 = scmp.lt.s32.totalorder %s810_s26, %s810_s26 }
  0x14   : > { %p801_p11 = pneg %p1026_p10  ;;  %p820_p7 = por %p819_p5, %p818_p3 }
  0x16   : > { %p813_p13 = pnand %p811_p12, %p801_p11 }
  0x18   : > { %p814_p0 = pneg %p813_p13 }
  0x1a   : > { %p821_p9 = pnand %p820_p7, %p814_p0 }
  0x1c   : > { %824 = shalt.err (!%p821_p9)
}
  0x1d   : > { %s951_s27 = smov 256   ;;  %s952_s28 = smov 16  }
  0x1e   : > { %730 = dma.hbm_to_vmem [thread:$0]  (!%p1026_p10), %s1170_s1, 12288, %s132_s22, [#allocation6], %s951_s27, %s951_s27, %s952_s28  }
  0x1f   : > { %s836_s4 = scalar_lea.vmem %s145_s25, 96  ;;  %p844_p2 = scmp.lt.s32.totalorder %s145_s25, %s145_s25 }
  0x20   : > { %p837_p1 = scmp.ne.s32.totalorder %s145_s25, %s836_s4  ;;  %p845_p6 = scmp.lt.s32.totalorder %s836_s4, %s836_s4 }
  0x22   : > { %p839_p12 = pnand %p837_p1, %p801_p11  ;;  %p846_p3 = por %p845_p6, %p844_p2 }
  0x24   : > { %p840_p13 = pneg %p839_p12 }
  0x26   : > { %p847_p0 = pnand %p846_p3, %p840_p13 }
  0x28   : > { %850 = shalt.err (!%p847_p0)
}
  0x29   : > { %s953_s5 = smov 32   ;;  %s954_s6 = smov 2  }
  0x2a   : > { %733 = dma.hbm_to_vmem [thread:$0]  (!%p1026_p10), %s1171_s2, 96, %s145_s25, [#allocation6], %s953_s5, %s953_s5, %s954_s6  }
  0x2b   : > { %s1049_s9 = sadd.s32 1, %s947_s15   ;;  %s27_s11 = sadd.s32 1, %s943_s14 }
  0x2c   : > { %s24_s10 = ssub.s32 %s947_s15, %s1049_s9  ;;  %p34_p2 = scmp.ne.s32.totalorder %s943_s14, %s939_s13 }
  0x2d   : > { %p25_p1 = scmp.eq.s32.totalorder %s24_s10, 0  ;;  %p35_p6 = scmp.eq.s32.totalorder %s947_s15, 0 }
  0x2e   : > { %p1181_p5 = scmp.eq.s32.totalorder %s999_s16, 3  ;;  %p744_p9 = scmp.lt.s32.totalorder %s947_s15, 4 }
  0x2f   : > { %s1058_s17 = scalar_select %p25_p1, %s943_s14, %s27_s11  }
  0x30   : > { %p36_p11 = por %p35_p6, %p34_p2  ;;  %p1062_p7 = por %p1181_p5, %p34_p2 }
  0x31   : > { %s158_s22 = sand.u32 1, %s943_s14   ;;  %s702_s24 = sshll.u32 %s947_s15, 7 }
  0x32   : > { %s1182_s21 = scalar_select %p1062_p7, 1, 0 }
  0x33   : > { %s701_s23 = sshll.u32 %s158_s22, 3  ;;  %s1072_s27 = scalar_lea.hbm %s1169_s0, %s702_s24 }
  0x34   : > { %s162_s28 = scalar_lea.vmem [#allocation2], %s701_s23  ;;  %p1074_p10 = pnand %p744_p9, %p36_p11 }
  0x35   : > { %s169_s29 = sshll.u32 %s162_s28, 4  ;;  %s159_s4 = scalar_lea.sflag [#allocation3], %s158_s22  ;;  %s170_s29 = int_to_ptr.vmem [resolvable:$true] %s169_s29 }
  0x36   : > { %s851_s5 = scalar_lea.hbm %s1072_s27, 128  ;;  %p853_p13 = pneg %p1074_p10 }
  0x37   : > { %p852_p12 = scmp.ne.s32.totalorder %s1072_s27, %s851_s5  ;;  %s856_s8 = scalar_lea.hbm %s1169_s0, 512 }
  0x38   : > { %p857_p1 = scmp.lt.s32.totalorder %s1072_s27, %s1169_s0  ;;  %p858_p2 = scmp.lt.s32.totalorder %s856_s8, %s851_s5 }
  0x39   : > { %p854_p3 = pnand %p853_p13, %p852_p12 }
  0x3a   : > { %p859_p6 = por %p858_p2, %p857_p1 }
  0x3b   : > { %p855_p0 = pneg %p854_p3 }
  0x3d   : > { %p860_p11 = pnand %p859_p6, %p855_p0 }
  0x3f   : > { %863 = shalt.err (!%p860_p11)
}
  0x40   : > { %s864_s23 = scalar_lea.vmem %s170_s29, 128  ;;  %s955_s22 = smov [#allocation2]  }
  0x41   : > { %p865_p5 = scmp.ne.s32.totalorder %s170_s29, %s864_s23  ;;  %s869_s24 = sshll.u32 %s955_s22, 4  ;;  %s870_s24 = int_to_ptr.vmem [resolvable:$false] %s869_s24 }
  0x42   : > { %s871_s25 = scalar_lea.vmem %s870_s24, 256  ;;  %p872_p12 = scmp.lt.s32.totalorder %s170_s29, %s870_s24 }
  0x43   : > { %p867_p9 = pnand %p865_p5, %p853_p13  ;;  %p873_p3 = scmp.lt.s32.totalorder %s871_s25, %s864_s23 }
  0x45   : > { %p868_p7 = pneg %p867_p9  ;;  %p874_p4 = por %p873_p3, %p872_p12 }
  0x47   : > { %p875_p8 = pnand %p874_p4, %p868_p7 }
  0x49   : > { %878 = shalt.err (!%p875_p8)
}
  0x4a   : > { %737 = dma.hbm_to_vmem [thread:$0]  (!%p1074_p10), %s1072_s27, 128, %s170_s29, %s159_s4  }
  0x4b   : > { %p1184_p0 = scmp.ne.s32.totalorder %s1179_s20, 0 }
  0x4c   : > { %s1095_s26 = sand.u32 (!%p1184_p0), 1, %s939_s13   ;;  %p1185_p4 = scmp.ne.s32.totalorder (!%p1184_p0), %s1177_s18, 0 }
  0x4d   : > { %178 = sbr.rel (%p1184_p0) target bundleno = 838 (0x346), region = 32  ;;  %s704_s28 = sshll.u32 (!%p1184_p0), %s1095_s26, 3 }
  0x4e   : > { %s181_s5 = scalar_lea.sflag (!%p1184_p0), [#allocation3], %s1095_s26  ;;  %s1101_s6 = scalar_lea.vmem (!%p1184_p0), [#allocation2], %s704_s28 }
  0x52   : > { %922 = dma.done.wait (%p1185_p4), %s181_s5, 128  }
  0x53   : > { %924 = vsyncadd (%p1185_p4), %s181_s5, 4294967168  ;;  %p1186_p8 = scmp.eq.s32.totalorder %s999_s16, 0 }
  0x55   : > { %926 = dma.done.wait (%p1186_p8), [#allocation6], 12384   ;;  %p1187_p7 = pmov %p1186_p8 }
  0x56   : > { %v956_v0 = vmov 0.0   ;;  %v247_v1 = vld [vmem:[#allocation5 + $0xf8] sm:$0xff]  ;;  %v246_v2 = vld [vmem:[#allocation5 + $0xf0] sm:$0xff]  ;;  %v245_v3 = vld [vmem:[#allocation5 + $0xe8] sm:$0xff]  ;;  %s712_s18 = sshll.u32 %s999_s16, 7  ;;  %s214_s20 = scalar_lea.vmem [#allocation8], %s704_s28 }
  0x57   : > { %928 = vsyncadd (%p1187_p7), [#allocation6], 4294954912  ;;  %324 = vmatprep.mubr.f32.mxu0 %v956_v0  ;;  %450 = vmatprep.mubr.f32.mxu1 %v956_v0  ;;  %v244_v4 = vld [vmem:[#allocation5 + $0xe0] sm:$0xff]  ;;  %v243_v5 = vld [vmem:[#allocation5 + $0xd8] sm:$0xff]  ;;  %s607_s27 = sshll.u32 %s214_s20, 4  ;;  %s605_s4 = scalar_lea.hbm %s1172_s3, %s712_s18  ;;  %s608_s27 = int_to_ptr.vmem [resolvable:$true] %s607_s27 }
  0x58   : > { %260 = vmatprep.subr.mxu0 %v247_v1  ;;  %v242_v6 = vld [vmem:[#allocation5 + $0xd0] sm:$0xff]  ;;  %v241_v7 = vld [vmem:[#allocation5 + $0xc8] sm:$0xff]  ;;  %v240_v8 = vld [vmem:[#allocation5 + $0xc0] sm:$0xff]  ;;  %s594_s7 = scalar_lea.sflag [#allocation4], %s1095_s26  ;;  %s879_s8 = scalar_lea.vmem %s608_s27, 128 }
  0x59   : > { %261 = vmatpush1.msra.mxu0 %v246_v2  ;;  %v239_v9 = vld [vmem:[#allocation5 + $0xb8] sm:$0xff]  ;;  %v238_v10 = vld [vmem:[#allocation5 + $0xb0] sm:$0xff]  ;;  %v237_v11 = vld [vmem:[#allocation5 + $0xa8] sm:$0xff]  ;;  %v250_v2 = vlaneseq  ;;  %p880_p10 = scmp.ne.s32.totalorder %s608_s27, %s879_s8  ;;  %p1188_p13 = scmp.ne.s32.totalorder %s1182_s21, 0 }
  0x5a   : > { %262 = vmatprep.subr.mxu0 %v245_v3  ;;  %v236_v12 = vld [vmem:[#allocation5 + $0xa0] sm:$0xff]  ;;  %v235_v13 = vld [vmem:[#allocation5 + $0x98] sm:$0xff]  ;;  %v234_v14 = vld [vmem:[#allocation5 + $0x90] sm:$0xff]  ;;  %s957_s10 = smov [#allocation8]  }
  0x5b   : > { %263 = vmatpush1.msra.mxu0 %v244_v4  ;;  %v233_v15 = vld [vmem:[#allocation5 + $0x88] sm:$0xff]  ;;  %v232_v16 = vld [vmem:[#allocation5 + $0x80] sm:$0xff]  ;;  %v231_v17 = vld [vmem:[#allocation5 + $0x78] sm:$0xff]  ;;  %v251_v3 = vshrl.u32 %v250_v2, 7  ;;  %p881_p1 = pnand %p880_p10, %p1188_p13  ;;  %s883_s11 = sshll.u32 %s957_s10, 4  ;;  %s884_s11 = int_to_ptr.vmem [resolvable:$false] %s883_s11 }
  0x5c   : > { %264 = vmatprep.subr.mxu0 %v243_v5  ;;  %v230_v18 = vld [vmem:[#allocation5 + $0x70] sm:$0xff]  ;;  %v229_v19 = vld [vmem:[#allocation5 + $0x68] sm:$0xff]  ;;  %v228_v20 = vld [vmem:[#allocation5 + $0x60] sm:$0xff]  ;;  %s885_s16 = scalar_lea.vmem %s884_s11, 256  ;;  %p886_p6 = scmp.lt.s32.totalorder %s608_s27, %s884_s11 }
  0x5d   : > { %265 = vmatpush1.msra.mxu0 %v242_v6  ;;  %v227_v21 = vld [vmem:[#allocation5 + $0x58] sm:$0xff]  ;;  %v226_v22 = vld [vmem:[#allocation5 + $0x50] sm:$0xff]  ;;  %v225_v23 = vld [vmem:[#allocation5 + $0x48] sm:$0xff]  ;;  %v1118_v4 = vsub.s32 1, %v251_v3  ;;  %p882_p2 = pneg %p881_p1  ;;  %p887_p11 = scmp.lt.s32.totalorder %s885_s16, %s879_s8 }
  0x5e   : > { %266 = vmatprep.subr.mxu0 %v241_v7  ;;  %v224_v24 = vld [vmem:[#allocation5 + $0x40] sm:$0xff]  ;;  %v223_v25 = vld [vmem:[#allocation5 + $0x38] sm:$0xff]  ;;  %v222_v26 = vld [vmem:[#allocation5 + $0x30] sm:$0xff] }
  0x5f   : > { %267 = vmatpush1.msra.mxu0 %v240_v8  ;;  %v221_v27 = vld [vmem:[#allocation5 + $0x28] sm:$0xff]  ;;  %v220_v28 = vld [vmem:[#allocation5 + $0x20] sm:$0xff]  ;;  %v219_v29 = vld [vmem:[#allocation5 + $0x18] sm:$0xff]  ;;  %p888_p5 = por %p887_p11, %p886_p6 }
  0x60   : > { %268 = vmatprep.subr.mxu0 %v239_v9  ;;  %v218_v30 = vld [vmem:[#allocation5 + $0x10] sm:$0xff]  ;;  %v217_v31 = vld [vmem:[#allocation5 + $0x8] sm:$0xff]  ;;  %v216_v32 = vld [vmem:[#allocation5] sm:$0xff] }
  0x61   : > { %269 = vmatpush1.msra.mxu0 %v238_v10  ;;  %v1114_v33 = vld [vmem:[%s1101_s6] sm:$0xff]  ;;  %v370_v36 = vld [vmem:[#allocation5 + $0x1e8] sm:$0xff]  ;;  %v369_v37 = vld [vmem:[#allocation5 + $0x1e0] sm:$0xff]  ;;  %p889_p9 = pnand %p888_p5, %p882_p2 }
  0x62   : > { %270 = vmatprep.subr.mxu0 %v237_v11  ;;  %v372_v34 = vld [vmem:[#allocation5 + $0x1f8] sm:$0xff]  ;;  %v371_v35 = vld [vmem:[#allocation5 + $0x1f0] sm:$0xff]  ;;  %v366_v40 = vld [vmem:[#allocation5 + $0x1c8] sm:$0xff] }
  0x63   : > { %271 = vmatpush1.msra.mxu0 %v236_v12  ;;  %386 = vmatprep.subr.mxu1 %v372_v34  ;;  %v368_v38 = vld [vmem:[#allocation5 + $0x1d8] sm:$0xff]  ;;  %v367_v39 = vld [vmem:[#allocation5 + $0x1d0] sm:$0xff]  ;;  %v365_v41 = vld [vmem:[#allocation5 + $0x1c0] sm:$0xff] }
  0x64   : > { %272 = vmatprep.subr.mxu0 %v235_v13  ;;  %387 = vmatpush1.msra.mxu1 %v371_v35  ;;  %v364_v42 = vld [vmem:[#allocation5 + $0x1b8] sm:$0xff]  ;;  %v363_v43 = vld [vmem:[#allocation5 + $0x1b0] sm:$0xff]  ;;  %v362_v44 = vld [vmem:[#allocation5 + $0x1a8] sm:$0xff]  ;;  %v1121_v13 = vsub.s32 0, %v251_v3 }
  0x65   : > { %273 = vmatpush1.msra.mxu0 %v234_v14  ;;  %388 = vmatprep.subr.mxu1 %v370_v36  ;;  %v361_v45 = vld [vmem:[#allocation5 + $0x1a0] sm:$0xff]  ;;  %v360_v46 = vld [vmem:[#allocation5 + $0x198] sm:$0xff]  ;;  %v359_v47 = vld [vmem:[#allocation5 + $0x190] sm:$0xff] }
  0x66   : > { %274 = vmatprep.subr.mxu0 %v233_v15  ;;  %389 = vmatpush1.msra.mxu1 %v369_v37  ;;  %v358_v48 = vld [vmem:[#allocation5 + $0x188] sm:$0xff]  ;;  %v357_v49 = vld [vmem:[#allocation5 + $0x180] sm:$0xff]  ;;  %v356_v50 = vld [vmem:[#allocation5 + $0x178] sm:$0xff] }
  0x67   : > { %275 = vmatpush1.msra.mxu0 %v232_v16  ;;  %390 = vmatprep.subr.mxu1 %v368_v38  ;;  %v355_v51 = vld [vmem:[#allocation5 + $0x170] sm:$0xff]  ;;  %v354_v52 = vld [vmem:[#allocation5 + $0x168] sm:$0xff]  ;;  %v353_v53 = vld [vmem:[#allocation5 + $0x160] sm:$0xff] }
  0x68   : > { %276 = vmatprep.subr.mxu0 %v231_v17  ;;  %391 = vmatpush1.msra.mxu1 %v367_v39  ;;  %v352_v54 = vld [vmem:[#allocation5 + $0x158] sm:$0xff]  ;;  %v351_v55 = vld [vmem:[#allocation5 + $0x150] sm:$0xff]  ;;  %v350_v56 = vld [vmem:[#allocation5 + $0x148] sm:$0xff] }
  0x69   : > { %277 = vmatpush1.msra.mxu0 %v230_v18  ;;  %392 = vmatprep.subr.mxu1 %v366_v40  ;;  %v349_v57 = vld [vmem:[#allocation5 + $0x140] sm:$0xff]  ;;  %v348_v58 = vld [vmem:[#allocation5 + $0x138] sm:$0xff]  ;;  %v347_v59 = vld [vmem:[#allocation5 + $0x130] sm:$0xff] }
  0x6a   : > { %278 = vmatprep.subr.mxu0 %v229_v19  ;;  %393 = vmatpush1.msra.mxu1 %v365_v41  ;;  %v346_v60 = vld [vmem:[#allocation5 + $0x128] sm:$0xff]  ;;  %v345_v61 = vld [vmem:[#allocation5 + $0x120] sm:$0xff]  ;;  %v344_v62 = vld [vmem:[#allocation5 + $0x118] sm:$0xff] }
  0x6b   : > { %279 = vmatpush1.msra.mxu0 %v228_v20  ;;  %394 = vmatprep.subr.mxu1 %v364_v42  ;;  %v343_v63 = vld [vmem:[#allocation5 + $0x110] sm:$0xff]  ;;  %v341_v1 = vld [vmem:[#allocation5 + $0x100] sm:$0xff]  ;;  %v498_v20 = vld [vmem:[#allocation5 + $0x2f8] sm:$0xff] }
  0x6c   : > { %280 = vmatprep.subr.mxu0 %v227_v21  ;;  %395 = vmatpush1.msra.mxu1 %v363_v43  ;;  %v248_v5 = vld [vmem:[#allocation7] sm:$0x3]  ;;  %v497_v21 = vld [vmem:[#allocation5 + $0x2f0] sm:$0xff]  ;;  %v484_v34 = vld [vmem:[#allocation5 + $0x288] sm:$0xff] }
  0x6d   : > { %281 = vmatpush1.msra.mxu0 %v226_v22  ;;  %396 = vmatprep.subr.mxu1 %v362_v44  ;;  %v257_v6 = vrot.slane %v248_v5, %v1118_v4  ;;  %v253_v14 = vrot.slane %v248_v5, %v1121_v13  ;;  %v496_v22 = vld [vmem:[#allocation5 + $0x2e8] sm:$0xff]  ;;  %v483_v35 = vld [vmem:[#allocation5 + $0x280] sm:$0xff]  ;;  %v482_v36 = vld [vmem:[#allocation5 + $0x278] sm:$0xff] }
  0x6e   : > { %282 = vmatprep.subr.mxu0 %v225_v23  ;;  %397 = vmatpush1.msra.mxu1 %v361_v45  ;;  %v495_v23 = vld [vmem:[#allocation5 + $0x2e0] sm:$0xff]  ;;  %v481_v37 = vld [vmem:[#allocation5 + $0x270] sm:$0xff]  ;;  %v480_v38 = vld [vmem:[#allocation5 + $0x268] sm:$0xff] }
  0x6f   : > { %283 = vmatpush1.msra.mxu0 %v224_v24  ;;  %398 = vmatprep.subr.mxu1 %v360_v46  ;;  %v494_v24 = vld [vmem:[#allocation5 + $0x2d8] sm:$0xff]  ;;  %v479_v39 = vld [vmem:[#allocation5 + $0x260] sm:$0xff]  ;;  %v477_v41 = vld [vmem:[#allocation5 + $0x250] sm:$0xff] }
  0x70   : > { %284 = vmatprep.subr.mxu0 %v223_v25  ;;  %399 = vmatpush1.msra.mxu1 %v359_v47  ;;  %v493_v25 = vld [vmem:[#allocation5 + $0x2d0] sm:$0xff]  ;;  %v478_v40 = vld [vmem:[#allocation5 + $0x258] sm:$0xff]  ;;  %v476_v42 = vld [vmem:[#allocation5 + $0x248] sm:$0xff] }
  0x71   : > { %285 = vmatpush1.msra.mxu0 %v222_v26  ;;  %400 = vmatprep.subr.mxu1 %v358_v48  ;;  %v492_v26 = vld [vmem:[#allocation5 + $0x2c8] sm:$0xff]  ;;  %v475_v43 = vld [vmem:[#allocation5 + $0x240] sm:$0xff]  ;;  %v474_v44 = vld [vmem:[#allocation5 + $0x238] sm:$0xff] }
  0x72   : > { %286 = vmatprep.subr.mxu0 %v221_v27  ;;  %401 = vmatpush1.msra.mxu1 %v357_v49  ;;  %v491_v27 = vld [vmem:[#allocation5 + $0x2c0] sm:$0xff]  ;;  %v473_v45 = vld [vmem:[#allocation5 + $0x230] sm:$0xff]  ;;  %v472_v46 = vld [vmem:[#allocation5 + $0x228] sm:$0xff] }
  0x73   : > { %287 = vmatpush1.msra.mxu0 %v220_v28  ;;  %402 = vmatprep.subr.mxu1 %v356_v50  ;;  %v490_v28 = vld [vmem:[#allocation5 + $0x2b8] sm:$0xff]  ;;  %v471_v47 = vld [vmem:[#allocation5 + $0x220] sm:$0xff]  ;;  %v469_v49 = vld [vmem:[#allocation5 + $0x210] sm:$0xff] }
  0x74   : > { %288 = vmatprep.subr.mxu0 %v219_v29  ;;  %403 = vmatpush1.msra.mxu1 %v355_v51  ;;  %v489_v29 = vld [vmem:[#allocation5 + $0x2b0] sm:$0xff]  ;;  %v470_v48 = vld [vmem:[#allocation5 + $0x218] sm:$0xff]  ;;  %v468_v50 = vld [vmem:[#allocation5 + $0x208] sm:$0xff] }
  0x75   : > { %289 = vmatpush1.msra.mxu0 %v218_v30  ;;  %404 = vmatprep.subr.mxu1 %v354_v52  ;;  %v488_v30 = vld [vmem:[#allocation5 + $0x2a8] sm:$0xff]  ;;  %v467_v51 = vld [vmem:[#allocation5 + $0x200] sm:$0xff] }
  0x76   : > { %290 = vmatprep.subr.mxu0 %v217_v31  ;;  %405 = vmatpush1.msra.mxu1 %v353_v53  ;;  %v487_v31 = vld [vmem:[#allocation5 + $0x2a0] sm:$0xff] }
  0x77   : > { %291 = vmatpush1.msra.mxu0 %v216_v32  ;;  %406 = vmatprep.subr.mxu1 %v352_v54  ;;  %v486_v32 = vld [vmem:[#allocation5 + $0x298] sm:$0xff]  ;;  %v374_v52 = vld [vmem:[#allocation7 + $0x2] sm:$0x3]  ;;  %v500_v2 = vld [vmem:[#allocation7 + $0x4] sm:$0x3] }
  0x78   : > { %325 = vmatmul.mubr.f32.vlgmr.msra.gmra.mxu0 %v1114_v33  ;;  %407 = vmatpush1.msra.mxu1 %v351_v55  ;;  %v383_v53 = vrot.slane %v374_v52, %v1118_v4  ;;  %v509_v3 = vrot.slane %v500_v2, %v1118_v4 }
  0x79   : > { %576 = vmatprep.mubr.f32.mxu0 %v956_v0  ;;  %408 = vmatprep.subr.mxu1 %v350_v56  ;;  %v342_v0 = vld [vmem:[#allocation5 + $0x108] sm:$0xff] }
  0x7a   : > { %409 = vmatpush1.msra.mxu1 %v349_v57  ;;  %512 = vmatprep.subr.mxu0 %v498_v20 }
  0x7b   : > { %410 = vmatprep.subr.mxu1 %v348_v58  ;;  %513 = vmatpush1.msra.mxu0 %v497_v21 }
  0x7c   : > { %411 = vmatpush1.msra.mxu1 %v347_v59  ;;  %514 = vmatprep.subr.mxu0 %v496_v22 }
  0x7d   : > { %412 = vmatprep.subr.mxu1 %v346_v60  ;;  %515 = vmatpush1.msra.mxu0 %v495_v23  ;;  %v379_v60 = vrot.slane %v374_v52, %v1121_v13 }
  0x7e   : > { %413 = vmatpush1.msra.mxu1 %v345_v61  ;;  %516 = vmatprep.subr.mxu0 %v494_v24 }
  0x7f   : > { %414 = vmatprep.subr.mxu1 %v344_v62  ;;  %517 = vmatpush1.msra.mxu0 %v493_v25 }
  0x80   : > { %415 = vmatpush1.msra.mxu1 %v343_v63  ;;  %518 = vmatprep.subr.mxu0 %v492_v26 }
  0x81   : > { %416 = vmatprep.subr.mxu1 %v342_v0  ;;  %519 = vmatpush1.msra.mxu0 %v491_v27 }
  0x82   : > { %417 = vmatpush1.msra.mxu1 %v341_v1  ;;  %520 = vmatprep.subr.mxu0 %v490_v28 }
  0x83   : > { %521 = vmatpush1.msra.mxu0 %v489_v29 }
  0x84   : > { %522 = vmatprep.subr.mxu0 %v488_v30 }
  0x85   : > { %523 = vmatpush1.msra.mxu0 %v487_v31 }
  0x86   : > { %524 = vmatprep.subr.mxu0 %v486_v32 }
 0x138   : > { %v326_v7 = vpop.f32.mrf.mxu0 }
 0x139   : > { %v327_v15 = vadd.f32 %v326_v7, %v253_v14 }
 0x13a   : > { %v328_v8 = vpop.f32.mrf.mxu0 }
 0x13b   : > { %v329_v9 = vadd.f32 %v328_v8, %v257_v6 }
 0x13d   : > { %v708_v10 = vmul.f32 -1.442695, %v329_v9 }
 0x13f   : > { %787 = vpow2.f32 %v708_v10 }
 0x14c   : > { %v788_v11 = vpop.eup %787 }
 0x14d   : > { %v334_v12 = vadd.f32 1.0, %v788_v11  ;;  %v505_v11 = vrot.slane %v500_v2, %v1121_v13 }
 0x14f   : > { %789 = vrcp.f32 %v334_v12 }
 0x15c   : > { %v790_v16 = vpop.eup %789 }
 0x15d   : > { %v337_v17 = vmul.f32 %v790_v16, %v327_v15 }
 0x15f   : > { %v338_v18 = vadd.f32 %v337_v17, %v1114_v33  ;;  %v485_v33 = vld [vmem:[#allocation5 + $0x290] sm:$0xff] }
 0x160   : > { %525 = vmatpush1.msra.mxu0 %v485_v33 }
 0x161   : > { %v1125_v19 = vmul.f32 0.70710677, %v338_v18  ;;  %526 = vmatprep.subr.mxu0 %v484_v34 }
 0x162   : > { %527 = vmatpush1.msra.mxu0 %v483_v35 }
 0x163   : > { %451 = vmatmul.mubr.f32.vlgmr.msra.gmra.mxu1 %v1125_v19  ;;  %528 = vmatprep.subr.mxu0 %v482_v36 }
 0x164   : > { %529 = vmatpush1.msra.mxu0 %v481_v37 }
 0x165   : > { %530 = vmatprep.subr.mxu0 %v480_v38 }
 0x166   : > { %531 = vmatpush1.msra.mxu0 %v479_v39 }
 0x167   : > { %532 = vmatprep.subr.mxu0 %v478_v40 }
 0x168   : > { %533 = vmatpush1.msra.mxu0 %v477_v41 }
 0x169   : > { %534 = vmatprep.subr.mxu0 %v476_v42 }
 0x16a   : > { %535 = vmatpush1.msra.mxu0 %v475_v43 }
 0x16b   : > { %536 = vmatprep.subr.mxu0 %v474_v44 }
 0x16c   : > { %537 = vmatpush1.msra.mxu0 %v473_v45 }
 0x16d   : > { %538 = vmatprep.subr.mxu0 %v472_v46 }
 0x16e   : > { %539 = vmatpush1.msra.mxu0 %v471_v47 }
 0x16f   : > { %540 = vmatprep.subr.mxu0 %v470_v48 }
 0x170   : > { %541 = vmatpush1.msra.mxu0 %v469_v49 }
 0x171   : > { %542 = vmatprep.subr.mxu0 %v468_v50 }
 0x172   : > { %543 = vmatpush1.msra.mxu0 %v467_v51 }
 0x223   : > { %v452_v54 = vpop.f32.mrf.mxu1 }
 0x224   : > { %v453_v61 = vadd.f32 %v452_v54, %v379_v60 }
 0x225   : > { %v454_v55 = vpop.f32.mrf.mxu1 }
 0x226   : > { %v455_v56 = vadd.f32 %v454_v55, %v383_v53 }
 0x228   : > { %v709_v57 = vmul.f32 -1.442695, %v455_v56 }
 0x22a   : > { %791 = vpow2.f32 %v709_v57 }
 0x237   : > { %v792_v58 = vpop.eup %791 }
 0x238   : > { %v460_v59 = vadd.f32 1.0, %v792_v58 }
 0x23a   : > { %793 = vrcp.f32 %v460_v59 }
 0x247   : > { %v794_v62 = vpop.eup %793 }
 0x248   : > { %v463_v63 = vmul.f32 %v794_v62, %v453_v61 }
 0x24a   : > { %v464_v0 = vadd.f32 %v463_v63, %v1125_v19 }
 0x24c   : > { %v465_v1 = vmul.f32 0.70710677, %v464_v0 }
 0x24e   : > { %577 = vmatmul.mubr.f32.vlgmr.msra.gmra.mxu0 %v465_v1 }
 0x30e   : > { %v578_v5 = vpop.f32.mrf.mxu0 }
 0x30f   : > { %v579_v12 = vadd.f32 %v578_v5, %v505_v11 }
 0x310   : > { %v580_v6 = vpop.f32.mrf.mxu0 }
 0x311   : > { %v581_v7 = vadd.f32 %v580_v6, %v509_v3 }
 0x313   : > { %v710_v8 = vmul.f32 -1.442695, %v581_v7 }
 0x315   : > { %795 = vpow2.f32 %v710_v8 }
 0x322   : > { %v796_v9 = vpop.eup %795 }
 0x323   : > { %v586_v10 = vadd.f32 1.0, %v796_v9 }
 0x325   : > { %797 = vrcp.f32 %v586_v10 }
 0x332   : > { %v798_v14 = vpop.eup %797 }
 0x333   : > { %v589_v15 = vmul.f32 %v798_v14, %v579_v12 }
 0x335   : > { %v590_v4 = vadd.f32 %v589_v15, %v465_v1 }
 0x337   : > { %v591_v16 = vmul.f32 0.70710677, %v590_v4 }
 0x339   : > { %592 = vst [vmem:[%s214_s20] sm:$0xff] %v591_v16 }
 0x33a   : > { %892 = shalt.err (!%p889_p9)
}
 0x33b   : > { %s893_s23 = scalar_lea.hbm %s605_s4, 128  ;;  %s897_s25 = scalar_lea.hbm %s1172_s3, 512 }
 0x33c   : > { %p894_p12 = scmp.ne.s32.totalorder %s605_s4, %s893_s23  ;;  %p898_p4 = scmp.lt.s32.totalorder %s605_s4, %s1172_s3 }
 0x33d   : > { %p899_p8 = scmp.lt.s32.totalorder %s897_s25, %s893_s23 }
 0x33e   : > { %p895_p3 = pnand %p894_p12, %p1188_p13 }
 0x33f   : > { %p900_p7 = por %p899_p8, %p898_p4 }
 0x340   : > { %p896_p0 = pneg %p895_p3 }
 0x342   : > { %p901_p10 = pnand %p900_p7, %p896_p0 }
 0x344   : > { %904 = shalt.err (!%p901_p10)
}
 0x345   : > { %725 = dma.vmem_to_hbm [thread:$0]  (%p1188_p13), %s608_s27, 128, %s605_s4, %s594_s7  }
 0x346 PF: > { %p747_p1 = scmp.ge.s32.totalorder %s947_s15, 2  ;;  %s619_s5 = sand.u32 1, %s935_s12  }
 0x347   : > { %p1189_p2 = scmp.ne.s32.totalorder %s1178_s19, 0  ;;  %s620_s6 = scalar_lea.sflag [#allocation4], %s619_s5 }
 0x349   : > { %p739_p6 = pnand %p747_p1, %p1189_p2 }
 0x34b   : > { %p740_p11 = pneg %p739_p6 }
 0x34d   : > { %930 = dma.done.wait (%p740_p11), %s620_s6, 128  }
 0x34e   : > { %932 = vsyncadd (%p740_p11), %s620_s6, 4294967168  ;;  %p17_p5 = scmp.ge.s32.totalorder %s1049_s9, 6   ;;  %s1190_s12 = smov %s939_s13 }
 0x34f   : > { %s1191_s13 = smov %s943_s14  ;;  %s1192_s14 = smov %s1058_s17 }
 0x350   : > { %s1193_s15 = smov %s1049_s9  ;;  %19 = sbr.rel (!%p17_p5) target bundleno = 6 (0x6), region = 89 }
 0x355   :  { %625 = vsyncpa [#allocation3], 1 }
 0x356   :  { %627 = vsyncpa [#allocation3 + $0x1], 1 }
 0x357   :  { %628 = vsyncpa [#allocation6], 1 }
 0x358   :  { %629 = vsyncpa [#allocation4], 1 }
 0x359   :  { %631 = vsyncpa [#allocation4 + $0x1], 1 }

</bundles_post_ra>
